<compile_context>
chip_gen: v7x
topology: tpu7x:2x2x1
jax: 0.10.0
libtpu: 0.0.40
codegen_flags: <defaults>
</compile_context>

<pallas_src>
import functools

import jax
import jax.numpy as jnp
from jax.experimental import pallas as pl
from jax.experimental.pallas import tpu as pltpu


_NEG_BIG = -1e30  # finite "-inf": masks padded vocab columns without inf/NaN risk


def _round_up(x: int, m: int) -> int:
    return ((x + m - 1) // m) * m


# --------------------------- device profiling ---------------------------------


def _device_profile():
    """Trace-time hardware query -> (vmem_bytes, tm_hint, tv_candidates,
    resident-tile budget, want >=2 row tiles)."""
    try:
        vmem = int(pltpu.get_tpu_info().vmem_capacity_bytes)
    except Exception:
        vmem = 128 << 20
    try:
        kind = jax.devices()[0].device_kind.lower()
    except Exception:
        kind = ""

    # Weight-streaming arithmetic intensity is ~tm FLOPs per weight byte; the
    # MXU/HBM balance point is ~240 rows (v5e), ~640-715 (v6e), ~310/TC (v7x).
    if "v6" in kind:
        tm_hint = 1024
        tv_candidates = (4096, 2048, 1024, 512, 256)   # 256-wide MXU N dim
    elif "v7" in kind:
        tm_hint = 512
        tv_candidates = (4096, 2048, 1024, 512, 256)
    else:                                              # v5e / unknown
        tm_hint = 512
        tv_candidates = (2048, 1024, 512, 256, 128)    # 128-wide MXU, 1 vst slot

    # Budget for resident/double-buffered tile data, leaving Mosaic-internal
    # headroom: ~96 MiB on 128 MiB parts (v5e/v6e), ~48 MiB on v7x (64 MiB/core).
    budget = min((vmem * 3) // 4, vmem - (16 << 20))
    two_row_tiles = ("v7" in kind) or (vmem <= (64 << 20))
    return vmem, tm_hint, tv_candidates, budget, two_row_tiles


def _vmem_limit(need_bytes: int, vmem_bytes: int) -> int:
    # Headroom for Mosaic-internal scratch, always below physical VMEM.
    return int(min(max(need_bytes + (12 << 20), 32 << 20), vmem_bytes - (4 << 20)))


# ------------------------------ tile planner ----------------------------------


def _fullv_bytes(tm, D, V, out_bytes):
    # x / out tiles double-buffered; resident weight & bias also double-buffered
    # by the default pipeline (constant index map -> fetched only once, though).
    return 2 * (tm * D * 2 + D * V * 2 + V * 4 + tm * V * out_bytes)


def _vtiled_bytes(tm, D, tv, v_pad, out_bytes):
    return (2 * (tm * D * 2 + D * tv * 2 + tv * 4 + tm * tv * out_bytes)
            + tm * v_pad * 4      # f32 logits cache (written once, read once)
            + 4 * tm * 4)         # running max / sum(exp)


def _plan(N, D, V, out_bytes, tm_req, tv_req, tm_hint, tv_cands, budget,
          two_row_tiles):
    """Pick (path, tm, tv, v_pad) from static shapes + device profile."""
    n8 = _round_up(max(N, 1), 8)

    def clamp_tm(t):
        return max(8, min(_round_up(max(t, 1), 8), n8))

    tm0 = clamp_tm(tm_req if tm_req is not None else tm_hint)
    if two_row_tiles and n8 > 8 and tm_req is None:
        # v7x: the row axis is the only 'parallel' grid axis and there are two
        # TensorCores per chip -> keep at least two row tiles so neither idles.
        tm0 = min(tm0, clamp_tm((N + 1) // 2))

    force_vtiled = tv_req is not None and tv_req < V

    # 1) weight-resident single pass (whole vocab in VMEM): one weight read,
    #    one matmul, lane-dense stores.  Preferred whenever it fits the budget.
    if not force_vtiled:
        for t in sorted({tm0, min(tm0, 512), min(tm0, 256), min(tm0, 128)},
                        reverse=True):
            if _fullv_bytes(t, D, V, out_bytes) <= budget:
                return "fullv", t, V, V

    # 2) vocab-tiled online-logsumexp with a resident f32 logits cache
    #    (weight streamed exactly once per row tile).
    cands = (tv_req,) if force_vtiled else tv_cands
    t = tm0
    while t >= 8:
        for tv in cands:
            if (not force_vtiled) and tv > _round_up(V, 128):
                continue
            v_pad = _round_up(V, tv)
            if _vtiled_bytes(t, D, tv, v_pad, out_bytes) <= budget:
                return "vtiled", t, tv, v_pad
        t = clamp_tm(t // 2) if t > 8 else 0

    # TODO(synk): add a logits-recompute fallback (no cache) for vocabularies so
    # large that even tm=8 cannot hold a (tm, V) f32 cache in VMEM.
    tv = cands[-1]
    return "vtiled", 8, tv, _round_up(V, tv)


# -------------------------------- kernels --------------------------------------


def _generator_fullv_kernel(x_ref, w_ref, b_ref, o_ref):
    """Single pass, whole vocab resident: rows tiled on grid axis 0."""
    logits = jnp.dot(x_ref[...], w_ref[...], preferred_element_type=jnp.float32)
    logits = logits + b_ref[...]
    m = jnp.max(logits, axis=-1, keepdims=True)
    lse = m + jnp.log(jnp.sum(jnp.exp(logits - m), axis=-1, keepdims=True))
    o_ref[...] = (logits - lse).astype(o_ref.dtype)


def _generator_vtiled_kernel(x_ref, w_ref, b_ref, o_ref, m_ref, l_ref, c_ref):
    """Vocab-tiled: grid = (row_tiles, 2 phases, vocab_tiles).

    Phase 0 streams the weight V-tiles ONCE, caches each f32 logits tile in
    VMEM (c_ref) and maintains the running row max / sum(exp) (online
    logsumexp).  Phase 1 does no weight DMA and no matmul: it reads the cached
    tile, subtracts the final logsumexp and stores normalized log-probs.  The
    x row tile stays resident across both phases (constant index map on axes
    1 and 2); the weight/bias index maps are pinned to the last V-tile during
    phase 1 so the weight is fetched exactly once per row tile.
    """
    phase = pl.program_id(1)
    j = pl.program_id(2)

    @pl.when(jnp.logical_and(phase == 0, j == 0))
    def _init():
        m_ref[...] = jnp.full_like(m_ref, -jnp.inf)
        l_ref[...] = jnp.zeros_like(l_ref)

    @pl.when(phase == 0)
    def _stats():
        logits = jnp.dot(x_ref[...], w_ref[...],
                         preferred_element_type=jnp.float32)
        logits = logits + b_ref[...]
        c_ref[j] = logits
        m_prev = m_ref[...]
        m_new = jnp.maximum(m_prev, jnp.max(logits, axis=-1, keepdims=True))
        l_ref[...] = (l_ref[...] * jnp.exp(m_prev - m_new)
                      + jnp.sum(jnp.exp(logits - m_new), axis=-1, keepdims=True))
        m_ref[...] = m_new

    @pl.when(phase == 1)
    def _write():
        lse = m_ref[...] + jnp.log(l_ref[...])
        o_ref[...] = (c_ref[j] - lse).astype(o_ref.dtype)


# -------------------------------- wrapper ---------------------------------------


@functools.partial(jax.jit, static_argnames=("tm", "vocab_tile", "out_dtype"))
def generator_forward(x, weight_t, bias, *, tm=None, vocab_tile=None,
                      out_dtype=jnp.float32):
    """log_softmax(x @ weight_t + bias, axis=-1).

    x: (B, S, D); weight_t: (D, V) (= nn.Linear(d_model, vocab).weight.T);
    bias: (V,).  Pass weight_t (and x) already in bfloat16 to avoid a full
    D*V cast-copy outside the kernel on every call; MXU operands are bf16
    either way, accumulation is f32.  out_dtype=bfloat16 halves output HBM
    traffic at ~0.4% rounding on the log-probs.
    """
    B, S, D = x.shape
    V = weight_t.shape[1]
    N = B * S
    out_bytes = jnp.dtype(out_dtype).itemsize

    if vocab_tile is not None and vocab_tile < V:
        assert vocab_tile % 128 == 0, "vocab_tile must be a multiple of 128"

    vmem, tm_hint, tv_cands, budget, two_tiles = _device_profile()
    path, tm_eff, tv, v_pad = _plan(N, D, V, out_bytes, tm, vocab_tile,
                                    tm_hint, tv_cands, budget, two_tiles)

    n_pad = _round_up(N, tm_eff)
    ni = n_pad // tm_eff

    x2d = x.reshape(N, D)
    if x2d.dtype != jnp.bfloat16:
        x2d = x2d.astype(jnp.bfloat16)          # bf16 MXU operand
    if n_pad != N:
        x2d = jnp.pad(x2d, ((0, n_pad - N), (0, 0)))
    w = weight_t if weight_t.dtype == jnp.bfloat16 else weight_t.astype(jnp.bfloat16)
    b2d = bias.astype(jnp.float32).reshape(1, V)
    if v_pad != V:
        # Padded vocab columns get a huge negative bias so they contribute
        # exp(~-1e30) = 0 to the softmax denominator; they are sliced off below.
        w = jnp.pad(w, ((0, 0), (0, v_pad - V)))
        b2d = jnp.pad(b2d, ((0, 0), (0, v_pad - V)), constant_values=_NEG_BIG)

    if path == "fullv":
        flops = 2 * n_pad * D * V
        vmem_need = _fullv_bytes(tm_eff, D, V, out_bytes)
        bytes_accessed = (n_pad * D * 2 + D * V * 2 + V * 4
                          + n_pad * V * out_bytes)
        out = pl.pallas_call(
            _generator_fullv_kernel,
            out_shape=jax.ShapeDtypeStruct((n_pad, V), out_dtype),
            grid_spec=pltpu.PrefetchScalarGridSpec(
                num_scalar_prefetch=0,
                grid=(ni,),
                in_specs=[
                    pl.BlockSpec((tm_eff, D), lambda i: (i, 0)),   # x rows
                    pl.BlockSpec((D, V), lambda i: (0, 0)),        # full weight
                    pl.BlockSpec((1, V), lambda i: (0, 0)),        # bias
                ],
                out_specs=pl.BlockSpec((tm_eff, V), lambda i: (i, 0)),
            ),
            compiler_params=pltpu.CompilerParams(
                dimension_semantics=("parallel",),
                vmem_limit_bytes=_vmem_limit(vmem_need, vmem)),
            cost_estimate=pl.CostEstimate(
                flops=flops, transcendentals=n_pad * (V + 1),
                bytes_accessed=bytes_accessed),
        )(x2d, w, b2d)
    else:
        nv = v_pad // tv
        flops = 2 * n_pad * D * v_pad                 # weight multiplied ONCE
        vmem_need = _vtiled_bytes(tm_eff, D, tv, v_pad, out_bytes)
        bytes_accessed = (n_pad * D * 2 + ni * (D * v_pad * 2 + v_pad * 4)
                          + n_pad * v_pad * out_bytes)

        # Phase 1 issues no weight/bias DMA: its block index is pinned to the
        # last V-tile, so it never changes after the end of phase 0.
        w_map = lambda i, p, j: (0, jnp.where(p == 0, j, nv - 1))
        b_map = lambda i, p, j: (0, jnp.where(p == 0, j, nv - 1))
        # The output window is parked on column-block 0 during phase 0 (never
        # written there); its block index only starts changing once phase 1
        # writes, so each output block is flushed to HBM exactly once, with
        # normalized data.  This relies on Pallas writing an output block back
        # only when its block index changes (current documented semantics).
        o_map = lambda i, p, j: (i, p * j)

        out = pl.pallas_call(
            _generator_vtiled_kernel,
            out_shape=jax.ShapeDtypeStruct((n_pad, v_pad), out_dtype),
            grid_spec=pltpu.PrefetchScalarGridSpec(
                num_scalar_prefetch=0,
                grid=(ni, 2, nv),
                in_specs=[
                    pl.BlockSpec((tm_eff, D), lambda i, p, j: (i, 0)),  # x rows
                    pl.BlockSpec((D, tv), w_map),                       # weight V-tile
                    pl.BlockSpec((1, tv), b_map),                       # bias V-tile
                ],
                out_specs=pl.BlockSpec((tm_eff, tv), o_map),
                scratch_shapes=[
                    pltpu.VMEM((tm_eff, 1), jnp.float32),       # running max
                    pltpu.VMEM((tm_eff, 1), jnp.float32),       # running sum(exp)
                    pltpu.VMEM((nv, tm_eff, tv), jnp.float32),  # f32 logits cache
                ],
            ),
            compiler_params=pltpu.CompilerParams(
                dimension_semantics=("parallel", "arbitrary", "arbitrary"),
                vmem_limit_bytes=_vmem_limit(vmem_need, vmem)),
            cost_estimate=pl.CostEstimate(
                flops=flops,
                transcendentals=n_pad * (v_pad + 2 * nv + 1),
                bytes_accessed=bytes_accessed),
        )(x2d, w, b2d)

    return out[:N, :V].reshape(B, S, V)


# --------------------------------- tests ----------------------------------------


if __name__ == "__main__":
    key = jax.random.PRNGKey(0)

    def make_inputs(k, B, S, D, V):
        kx, kw, kb = jax.random.split(k, 3)
        weight_t = jax.random.normal(kw, (D, V), jnp.float32) / jnp.sqrt(D)
        bias = jax.random.normal(kb, (V,), jnp.float32) * 0.01
        x = jax.random.normal(kx, (B, S, D), jnp.float32)
        return x, weight_t, bias

    def reference(x, weight_t, bias):
        # Same bf16 operand rounding as the kernel, f32 accumulation.
        logits = jnp.dot(x.astype(jnp.bfloat16), weight_t.astype(jnp.bfloat16),
                         preferred_element_type=jnp.float32) + bias
        return jax.nn.log_softmax(logits, axis=-1)

    k1, k2, k3 = jax.random.split(key, 3)

    # 1) Small vocab -> weight-resident single-pass kernel.  Pass the weight in
    #    bf16 (recommended persistent storage) so no per-call cast is paid.
    x, wt, b = make_inputs(k1, 2, 8, 32, 128)
    out = jax.block_until_ready(
        generator_forward(x, wt.astype(jnp.bfloat16), b))
    assert out.shape == (2, 8, 128) and out.dtype == jnp.float32
    assert jnp.allclose(out, reference(x, wt, b), atol=2e-3, rtol=2e-3)

    # 2) Forced vocab tiling (online-logsumexp + logits cache path) with a
    #    ragged row count (row padding).
    x, wt, b = make_inputs(k2, 3, 5, 64, 512)
    out = jax.block_until_ready(generator_forward(x, wt, b, vocab_tile=128))
    assert out.shape == (3, 5, 512) and out.dtype == jnp.float32
    assert jnp.allclose(out, reference(x, wt, b), atol=2e-3, rtol=2e-3)

    # 3) Non-tile-divisible vocab (V padded + masked) and bf16 output.
    x, wt, b = make_inputs(k3, 2, 6, 32, 320)
    out = jax.block_until_ready(
        generator_forward(x, wt, b, vocab_tile=128, out_dtype=jnp.bfloat16))
    assert out.shape == (2, 6, 320) and out.dtype == jnp.bfloat16
    assert jnp.allclose(out.astype(jnp.float32), reference(x, wt, b),
                        atol=5e-2, rtol=5e-2)

    print("KERNEL_OK")
</pallas_src>

<mosaic_0001>
module attributes {stable_mosaic.version = 11 : i64} {
  func.func @_generator_fullv_kernel(%arg0: i32, %arg1: memref<16x32xbf16, #tpu.memory_space<vmem>>, %arg2: memref<32x128xbf16, #tpu.memory_space<vmem>>, %arg3: memref<1x128xf32, #tpu.memory_space<vmem>>, %arg4: memref<16x128xf32, #tpu.memory_space<vmem>>) attributes {dimension_semantics = [#tpu.dimension_semantics<parallel>], iteration_bounds = array<i64: 1>, scalar_prefetch = 0 : i64, scratch_operands = 0 : i64, tpu.core_type = #tpu.core_type<tc>, window_params = [{transform_indices = @transform_0, window_bounds = array<i64: 16, 32>}, {pipeline_mode = #tpu.pipeline_mode<synchronous>, transform_indices = @transform_1, window_bounds = array<i64: 32, 128>}, {pipeline_mode = #tpu.pipeline_mode<synchronous>, transform_indices = @transform_2, window_bounds = array<i64: 1, 128>}, {transform_indices = @transform_3, window_bounds = array<i64: 16, 128>}]} {
    %c0 = arith.constant 0 : index
    %c0_0 = arith.constant 0 : index
    %0 = vector.load %arg1[%c0, %c0_0] : memref<16x32xbf16, #tpu.memory_space<vmem>>, vector<16x32xbf16>
    %c0_1 = arith.constant 0 : index
    %c0_2 = arith.constant 0 : index
    %1 = vector.load %arg2[%c0_1, %c0_2] : memref<32x128xbf16, #tpu.memory_space<vmem>>, vector<32x128xbf16>
    %cst = arith.constant dense<0.000000e+00> : vector<16x128xf32>
    %2 = tpu.matmul %0, %1, %cst {dimension_numbers = #tpu.dot_dimension_numbers<[1], [0], [0], [1], [0, 0, 1, 1], [], []>} : vector<16x32xbf16>, vector<32x128xbf16>, vector<16x128xf32> -> vector<16x128xf32>
    %c0_3 = arith.constant 0 : index
    %c0_4 = arith.constant 0 : index
    %3 = vector.load %arg3[%c0_3, %c0_4] : memref<1x128xf32, #tpu.memory_space<vmem>>, vector<1x128xf32>
    %4 = vector.broadcast %3 : vector<1x128xf32> to vector<16x128xf32>
    %5 = arith.addf %2, %4 : vector<16x128xf32>
    %cst_5 = arith.constant dense<0xFF800000> : vector<16xf32>
    %6 = vector.multi_reduction <maximumf>, %5, %cst_5 [1] : vector<16x128xf32> to vector<16xf32>
    %7 = vector.shape_cast %6 : vector<16xf32> to vector<16x1xf32>
    %8 = vector.broadcast %7 : vector<16x1xf32> to vector<16x128xf32>
    %9 = arith.subf %5, %8 : vector<16x128xf32>
    %10 = math.exp %9 : vector<16x128xf32>
    %cst_6 = arith.constant dense<0.000000e+00> : vector<16xf32>
    %11 = vector.multi_reduction <add>, %10, %cst_6 [1] : vector<16x128xf32> to vector<16xf32>
    %12 = vector.shape_cast %11 : vector<16xf32> to vector<16x1xf32>
    %13 = math.log %12 : vector<16x1xf32>
    %14 = arith.addf %7, %13 : vector<16x1xf32>
    %15 = vector.broadcast %14 : vector<16x1xf32> to vector<16x128xf32>
    %16 = arith.subf %5, %15 : vector<16x128xf32>
    %c0_7 = arith.constant 0 : index
    %c0_8 = arith.constant 0 : index
    %17 = vector.load %arg4[%c0_7, %c0_8] : memref<16x128xf32, #tpu.memory_space<vmem>>, vector<16x128xf32>
    tpu.vector_store %arg4[%c0_7, %c0_8], %16 {strides = array<i32>} : memref<16x128xf32, #tpu.memory_space<vmem>>, vector<16x128xf32>,
    return
  }
  func.func @transform_0(%arg0: i32) -> (i32, i32) {
    %c0_i32 = arith.constant 0 : i32
    %c0_i32_0 = arith.constant 0 : i32
    return %arg0, %c0_i32 : i32, i32
  }
  func.func @transform_1(%arg0: i32) -> (i32, i32) {
    %c0_i32 = arith.constant 0 : i32
    %c0_i32_0 = arith.constant 0 : i32
    %c0_i32_1 = arith.constant 0 : i32
    return %c0_i32, %c0_i32_0 : i32, i32
  }
  func.func @transform_2(%arg0: i32) -> (i32, i32) {
    %c0_i32 = arith.constant 0 : i32
    %c0_i32_0 = arith.constant 0 : i32
    %c0_i32_1 = arith.constant 0 : i32
    return %c0_i32, %c0_i32_0 : i32, i32
  }
  func.func @transform_3(%arg0: i32) -> (i32, i32) {
    %c0_i32 = arith.constant 0 : i32
    %c0_i32_0 = arith.constant 0 : i32
    return %arg0, %c0_i32 : i32, i32
  }
}

</mosaic_0001>

<bundles_post_ra>
// kernel: generator_forward.1
= control target key start
LH: loop header
LB: loop body
LE: loop exit
PB: predicated region body
PF: predicated region fallthrough
CT: control target
= control target key end

     0   :  { %v187_v1 = vmov 0.0   ;;  %vm188_vm0 = vmmov 0   ;;  %s236_s0 = inlined_call_operand.vmem [shape: bf16[16,32], index: 0, kind: input, shape index: {}]   ;;  %s237_s1 = inlined_call_operand.vmem [shape: bf16[32,128], index: 1, kind: input, shape index: {}]   ;;  %s238_s2 = inlined_call_operand.vmem [shape: f32[1,128], index: 2, kind: input, shape index: {}]   ;;  %s239_s3 = inlined_call_operand.hbm [shape: f32[16,128], index: 3, kind: output, shape index: {}]  }
   0x1   :  { %v152_v0 = vld [vmem:[%s237_s1] sm:$0xff]   ;;  %139 = vmatprep.subr.bf16.mxu0 %v187_v1  ;;  %v153_v2 = vld [vmem:[%s237_s1 + $0x8] sm:$0xff]   ;;  %143 = vmatprep.mubr.msk.bf16.mxu0 %vm188_vm0, %v187_v1 }
   0x2   :  { %140 = vmatpush3.bf16.msra.mxu0 %v152_v0 }
   0x3   :  { %141 = vmatprep.subr.bf16.mxu0 %v187_v1 }
   0x4   :  { %8 = vsyncpa [#allocation3], 0  ;;  %v154_v3 = vld [vmem:[%s236_s0] sm:$0xff]   ;;  %vm46_vm1 = vcmask 261120   ;;  %s189_s0 = smov [#allocation2]  }
   0x5   :  { %v131_v4 = vld [vmem:[%s238_s2] ss:$0 sm:$0xff]  ;;  %s120_s1 = sshll.u32 %s189_s0, 4  ;;  %s121_s1 = int_to_ptr.vmem [resolvable:$true] %s120_s1 }
   0x6   :  { %142 = vmatpush3.bf16.msra.mxu0 %v153_v2  ;;  %s163_s2 = scalar_lea.vmem %s121_s1, 256  ;;  %p168_p1 = scmp.lt.s32.totalorder %s121_s1, %s121_s1 }
   0x7   :  { %p164_p0 = scmp.ne.s32.totalorder %s121_s1, %s163_s2  ;;  %p169_p2 = scmp.lt.s32.totalorder %s163_s2, %s163_s2 }
   0x9   :  { %144 = vmatmul.mubr.msk.bf16.vlgmr.msra.gmra.mrb[0].mxu0 %vm46_vm1, %v154_v3  ;;  %p170_p3 = por %p169_p2, %p168_p1 }
   0xb   :  { %p171_p4 = pnand %p170_p3, %p164_p0 }
  0xdc   :  { %v84_v5 = vpop.f32.mrb[0].mxu0 }
  0xdd   :  { %v85_v6 = vadd.f32 %v131_v4, %v84_v5  ;;  %v145_v7 = vpop.f32.mrb[1].mxu0 }
  0xde   :  { %v87_v8 = vpop.f32.mrb[2].mxu0 }
  0xdf   :  { %91 = vmax.xlane.f32.xlu0 %v85_v6  ;;  %v146_v9 = vpop.f32.mrb[3].mxu0  ;;  %v88_v10 = vadd.f32 %v131_v4, %v87_v8 }
  0xe3   :  { %93 = vmax.xlane.f32.xlu0 %v88_v10 }
 0x16c   :  { %v92_v11 = vpop.xlane.xlu0 %91 }
 0x16d   :  { %v95_v12 = vsub.f32 %v85_v6, %v92_v11 }
 0x16f   :  { %v97_v13 = vmul.f32 1.442695, %v95_v12 }
 0x170   :  { %v94_v14 = vpop.xlane.xlu0 %93 }
 0x171   :  { %v96_v15 = vsub.f32 %v88_v10, %v94_v14  ;;  %155 = vpow2.f32 %v97_v13 }
 0x173   :  { %v99_v16 = vmul.f32 1.442695, %v96_v15 }
 0x175   :  { %157 = vpow2.f32 %v99_v16 }
 0x17b   :  { %v156_v17 = vpop.eup %155 }
 0x17c   :  { %101 = vadd.xlane.f32.xlu1 %v156_v17 }
 0x17f   :  { %v158_v18 = vpop.eup %157 }
 0x180   :  { %103 = vadd.xlane.f32.xlu1 %v158_v18 }
 0x209   :  { %v102_v19 = vpop.xlane.xlu1 %101 }
 0x20a   :  { %159 = vlog2.f32 %v102_v19 }
 0x20d   :  { %v104_v20 = vpop.xlane.xlu1 %103 }
 0x20e   :  { %161 = vlog2.f32 %v104_v20 }
 0x214   :  { %v160_v21 = vpop.eup %159 }
 0x215   :  { %v106_v22 = vmul.f32 0.6931472, %v160_v21 }
 0x217   :  { %v109_v23 = vadd.f32 %v106_v22, %v92_v11 }
 0x218   :  { %v162_v24 = vpop.eup %161 }
 0x219   :  { %v111_v25 = vsub.f32 %v85_v6, %v109_v23  ;;  %v108_v26 = vmul.f32 0.6931472, %v162_v24 }
 0x21b   :  { %113 = vst [vmem:[#allocation2] sm:$0xff] %v111_v25  ;;  %v110_v27 = vadd.f32 %v108_v26, %v94_v14 }
 0x21d   :  { %v112_v28 = vsub.f32 %v88_v10, %v110_v27 }
 0x21f   :  { %114 = vst [vmem:[#allocation2 + $0x8] sm:$0xff] %v112_v28 }
 0x220   :  { %174 = shalt.err (!%p171_p4)
}
 0x221   :  { %s175_s22 = scalar_lea.hbm %s239_s3, 256 }
 0x222   :  { %p176_p5 = scmp.ne.s32.totalorder %s239_s3, %s175_s22  ;;  %p179_p6 = scmp.lt.u32.totalorder %s175_s22, %s239_s3 }
 0x224   :  { %p181_p7 = pnand %p179_p6, %p176_p5 }
 0x226   :  { %184 = shalt.err (!%p181_p7)
}
 0x227   :  { %s190_s27 = smov 128   ;;  %s191_s28 = smov 8  }
 0x228   :  { %126 = dma.vmem_to_hbm [thread:$0]  %s121_s1, 256, %s239_s3, [#allocation3], %s190_s27, %s190_s27, %s191_s28  }
 0x229   :  { %185 = dma.done.wait [#allocation3], 256  }
 0x22a   :  { %186 = vsyncadd [#allocation3], 4294967040 }
 0x22b   :  { %130 = vsyncpa [#allocation3], 1 }

</bundles_post_ra>
